<compile_context>
chip_gen: v7x
topology: tpu7x:2x2x1
jax: 0.10.0
libtpu: 0.0.40
codegen_flags: <defaults>
</compile_context>

<pallas_src>
import jax
import jax.numpy as jnp
from jax.experimental import pallas as pl
from jax.experimental.pallas import tpu as pltpu


def _attn_kernel(g_ref, x_ref, wg_ref, wx_ref, wpsi_ref,
                 gb_ref, xb_ref, pb_ref, o_ref):
    # g_ref: (1, F_g, tm)    x_ref: (1, F_l, tm)
    # wg_ref: (F_int, F_g)   wx_ref: (F_int, F_l)   wpsi_ref: (F_int, 1)
    # gb_ref/xb_ref: (F_int, 1)      pb_ref: (1, 1) scalar in SMEM
    g_blk = g_ref[0]                      # (F_g, tm)
    x_blk = x_ref[0]                      # (F_l, tm)

    # BN scale is pre-folded into the weights; only the bias column remains.
    x1 = jnp.dot(wx_ref[...], x_blk, preferred_element_type=jnp.float32) + xb_ref[...]
    g1 = jnp.dot(wg_ref[...], g_blk, preferred_element_type=jnp.float32) + gb_ref[...]

    t = jnp.maximum(g1 + x1, 0.0)                                   # (F_int, tm)

    # psi: contraction over F_int lives on sublanes -> VPU mul + XLU reduce.
    p = jnp.sum(t * wpsi_ref[...], axis=0, keepdims=True) + pb_ref[0, 0]   # (1, tm)
    psi = jax.nn.sigmoid(p)

    o_ref[0] = (x1 * psi).astype(o_ref.dtype)


def _pick_tile(hw, f_g, f_l, f_int, vmem_budget_bytes):
    # f32 bytes per spatial column resident in VMEM:
    #   double-buffered g+x inputs, double-buffered output, ~3 live (F_int,·)
    #   intermediates (g1, x1, t).  Weights/bias columns are negligible.
    per_col = 4 * (2 * (f_g + f_l) + 2 * f_int + 3 * f_int)
    tm = vmem_budget_bytes // max(per_col, 1)
    tm = max(128, min(2048, (tm // 128) * 128))
    if hw <= tm:
        return hw            # whole spatial extent in one lane-dense tile
    return tm


def attention_block_pallas(g, x, folded, *, tm=None,
                           vmem_budget_bytes=36 * 1024 * 1024,
                           out_dtype=None):
    """g: (N, F_g, H, W), x: (N, F_l, H, W) -> (N, F_int, H, W)."""
    N, F_g, H, W = g.shape
    Nx, F_l, Hx, Wx = x.shape
    assert (N, H, W) == (Nx, Hx, Wx)
    F_int = folded["wg"].shape[0]
    HW = H * W
    out_dtype = out_dtype or x.dtype     # set to jnp.bfloat16 to halve HBM writes

    if tm is None:
        tm = _pick_tile(HW, F_g, F_l, F_int, vmem_budget_bytes)

    # NCHW -> (N, C, H*W): pure reshape, zero data movement.
    g3 = g.reshape(N, F_g, HW)
    x3 = x.reshape(N, F_l, HW)

    grid = (N, pl.cdiv(HW, tm))
    full2d = lambda shape: pl.BlockSpec(shape, lambda n, j: (0, 0))

    out = pl.pallas_call(
        _attn_kernel,
        out_shape=jax.ShapeDtypeStruct((N, F_int, HW), out_dtype),
        grid_spec=pltpu.PrefetchScalarGridSpec(
            num_scalar_prefetch=0,
            grid=grid,
            in_specs=[
                pl.BlockSpec((1, F_g, tm), lambda n, j: (n, 0, j)),   # g block
                pl.BlockSpec((1, F_l, tm), lambda n, j: (n, 0, j)),   # x block
                full2d((F_int, F_g)),                                 # wg (BN-folded)
                full2d((F_int, F_l)),                                 # wx (BN-folded)
                full2d((F_int, 1)),                                   # wpsi (BN-folded)
                full2d((F_int, 1)),                                   # g bias column
                full2d((F_int, 1)),                                   # x bias column
                pl.BlockSpec(memory_space=pltpu.MemorySpace.SMEM),    # psi bias (1,1)
            ],
            out_specs=pl.BlockSpec((1, F_int, tm), lambda n, j: (n, 0, j)),
        ),
        compiler_params=pltpu.CompilerParams(
            dimension_semantics=("parallel", "parallel"),
            vmem_limit_bytes=64 * 1024 * 1024,
        ),
    )(g3, x3, folded["wg"], folded["wx"], folded["wpsi"],
      folded["gb"], folded["xb"], folded["pb"])

    return out.reshape(N, F_int, H, W)


def make_params(key, F_g, F_l, F_int):
    """Raw parameters mirroring the PyTorch module (conv weights + BN stats)."""
    ks = jax.random.split(key, 15)

    def bn(k0, k1, k2, k3, c):
        gamma = 1.0 + 0.1 * jax.random.normal(k0, (c,), jnp.float32)
        beta = 0.1 * jax.random.normal(k1, (c,), jnp.float32)
        mean = 0.1 * jax.random.normal(k2, (c,), jnp.float32)
        var = jnp.abs(jax.random.normal(k3, (c,), jnp.float32)) + 0.5
        return gamma, beta, mean, var

    return dict(
        wg=0.1 * jax.random.normal(ks[0], (F_int, F_g), jnp.float32),   # (out, in)
        wx=0.1 * jax.random.normal(ks[1], (F_int, F_l), jnp.float32),
        wpsi=0.1 * jax.random.normal(ks[2], (1, F_int), jnp.float32),
        bn_g=bn(ks[3], ks[4], ks[5], ks[6], F_int),
        bn_x=bn(ks[7], ks[8], ks[9], ks[10], F_int),
        bn_psi=bn(ks[11], ks[12], ks[13], ks[14], 1),
    )


def fold_params(p, eps=1e-5):
    """Fold inference-mode BatchNorm into the 1x1 conv weights (exact)."""
    def fold(w, bn):                   # w: (Cout, Cin)
        gamma, beta, mean, var = bn
        scale = gamma / jnp.sqrt(var + eps)
        return w * scale[:, None], (beta - mean * scale)

    wg_f, gb = fold(p["wg"], p["bn_g"])
    wx_f, xb = fold(p["wx"], p["bn_x"])
    wpsi_f, pb = fold(p["wpsi"], p["bn_psi"])
    return dict(
        wg=wg_f, wx=wx_f,
        wpsi=wpsi_f.reshape(-1, 1),            # (F_int, 1) column for sublane mul
        gb=gb.reshape(-1, 1), xb=xb.reshape(-1, 1),
        pb=pb.reshape(1, 1),
    )


def attention_block_ref(g, x, p, eps=1e-5):
    """Pure-JAX replica of the PyTorch forward (unfolded, NCHW)."""
    def conv_bn(inp, w, bn):           # w: (Cout, Cin)
        gamma, beta, mean, var = bn
        y = jnp.einsum('oc,nchw->nohw', w, inp)
        scale = gamma / jnp.sqrt(var + eps)
        return y * scale[None, :, None, None] + (beta - mean * scale)[None, :, None, None]

    g1 = conv_bn(g, p["wg"], p["bn_g"])
    x1 = conv_bn(x, p["wx"], p["bn_x"])
    t = jnp.maximum(g1 + x1, 0.0)
    # psi: 1-output-channel conv done as mul+sum (matches kernel math exactly)
    gamma, beta, mean, var = p["bn_psi"]
    scale = gamma[0] / jnp.sqrt(var[0] + eps)
    pre = jnp.sum(t * p["wpsi"][0][None, :, None, None], axis=1, keepdims=True)
    psi = jax.nn.sigmoid(pre * scale + (beta[0] - mean[0] * scale))
    return x1 * psi                    # PyTorch reassigns x = W_x(x) before the gate


if __name__ == "__main__":
    key = jax.random.PRNGKey(0)
    k_g, k_x, k_p = jax.random.split(key, 3)

    N, F_g, F_l, F_int, H, W = 2, 4, 4, 8, 16, 16
    g = jax.random.normal(k_g, (N, F_g, H, W), jnp.float32)
    x = jax.random.normal(k_x, (N, F_l, H, W), jnp.float32)

    raw = make_params(k_p, F_g, F_l, F_int)
    folded = fold_params(raw)

    out = attention_block_pallas(g, x, folded)
    out = jax.block_until_ready(out)

    ref = attention_block_ref(g, x, raw)
    assert out.shape == (N, F_int, H, W)
    assert jnp.allclose(out, ref, atol=1e-4, rtol=1e-4), \
        float(jnp.max(jnp.abs(out - ref)))

    print("KERNEL_OK")
</pallas_src>

<mosaic_0001>
module attributes {stable_mosaic.version = 11 : i64} {
  func.func @_attn_kernel(%arg0: i32, %arg1: i32, %arg2: memref<1x4x256xf32, #tpu.memory_space<vmem>>, %arg3: memref<1x4x256xf32, #tpu.memory_space<vmem>>, %arg4: memref<8x4xf32, #tpu.memory_space<vmem>>, %arg5: memref<8x4xf32, #tpu.memory_space<vmem>>, %arg6: memref<8x1xf32, #tpu.memory_space<vmem>>, %arg7: memref<8x1xf32, #tpu.memory_space<vmem>>, %arg8: memref<8x1xf32, #tpu.memory_space<vmem>>, %arg9: memref<1x1xf32, #tpu.memory_space<smem>>, %arg10: memref<1x8x256xf32, #tpu.memory_space<vmem>>) attributes {dimension_semantics = [#tpu.dimension_semantics<parallel>, #tpu.dimension_semantics<parallel>], iteration_bounds = array<i64: 2, 1>, scalar_prefetch = 0 : i64, scratch_operands = 0 : i64, tpu.core_type = #tpu.core_type<tc>, window_params = [{transform_indices = @transform_0, window_bounds = array<i64: 1, 4, 256>}, {transform_indices = @transform_1, window_bounds = array<i64: 1, 4, 256>}, {pipeline_mode = #tpu.pipeline_mode<synchronous>, transform_indices = @transform_2, window_bounds = array<i64: 8, 4>}, {pipeline_mode = #tpu.pipeline_mode<synchronous>, transform_indices = @transform_3, window_bounds = array<i64: 8, 4>}, {pipeline_mode = #tpu.pipeline_mode<synchronous>, transform_indices = @transform_4, window_bounds = array<i64: 8, 1>}, {pipeline_mode = #tpu.pipeline_mode<synchronous>, transform_indices = @transform_5, window_bounds = array<i64: 8, 1>}, {pipeline_mode = #tpu.pipeline_mode<synchronous>, transform_indices = @transform_6, window_bounds = array<i64: 8, 1>}, {transform_indices = @transform_7, window_bounds = array<i64: 1, 1>}, {transform_indices = @transform_8, window_bounds = array<i64: 1, 8, 256>}]} {
    %c0 = arith.constant 0 : index
    %c0_0 = arith.constant 0 : index
    %c0_1 = arith.constant 0 : index
    %0 = vector.load %arg2[%c0, %c0_0, %c0_1] : memref<1x4x256xf32, #tpu.memory_space<vmem>>, vector<1x4x256xf32>
    %1 = vector.shape_cast %0 : vector<1x4x256xf32> to vector<4x256xf32>
    %c0_2 = arith.constant 0 : index
    %c0_3 = arith.constant 0 : index
    %c0_4 = arith.constant 0 : index
    %2 = vector.load %arg3[%c0_2, %c0_3, %c0_4] : memref<1x4x256xf32, #tpu.memory_space<vmem>>, vector<1x4x256xf32>
    %3 = vector.shape_cast %2 : vector<1x4x256xf32> to vector<4x256xf32>
    %c0_5 = arith.constant 0 : index
    %c0_6 = arith.constant 0 : index
    %4 = vector.load %arg5[%c0_5, %c0_6] : memref<8x4xf32, #tpu.memory_space<vmem>>, vector<8x4xf32>
    %cst = arith.constant dense<0.000000e+00> : vector<8x256xf32>
    %5 = tpu.matmul %4, %3, %cst {dimension_numbers = #tpu.dot_dimension_numbers<[1], [0], [0], [1], [0, 0, 1, 1], [], []>} : vector<8x4xf32>, vector<4x256xf32>, vector<8x256xf32> -> vector<8x256xf32>
    %c0_7 = arith.constant 0 : index
    %c0_8 = arith.constant 0 : index
    %6 = vector.load %arg8[%c0_7, %c0_8] : memref<8x1xf32, #tpu.memory_space<vmem>>, vector<8x1xf32>
    %7 = vector.broadcast %6 : vector<8x1xf32> to vector<8x256xf32>
    %8 = arith.addf %5, %7 : vector<8x256xf32>
    %c0_9 = arith.constant 0 : index
    %c0_10 = arith.constant 0 : index
    %9 = vector.load %arg4[%c0_9, %c0_10] : memref<8x4xf32, #tpu.memory_space<vmem>>, vector<8x4xf32>
    %cst_11 = arith.constant dense<0.000000e+00> : vector<8x256xf32>
    %10 = tpu.matmul %9, %1, %cst_11 {dimension_numbers = #tpu.dot_dimension_numbers<[1], [0], [0], [1], [0, 0, 1, 1], [], []>} : vector<8x4xf32>, vector<4x256xf32>, vector<8x256xf32> -> vector<8x256xf32>
    %c0_12 = arith.constant 0 : index
    %c0_13 = arith.constant 0 : index
    %11 = vector.load %arg7[%c0_12, %c0_13] : memref<8x1xf32, #tpu.memory_space<vmem>>, vector<8x1xf32>
    %12 = vector.broadcast %11 : vector<8x1xf32> to vector<8x256xf32>
    %13 = arith.addf %10, %12 : vector<8x256xf32>
    %14 = arith.addf %13, %8 : vector<8x256xf32>
    %cst_14 = arith.constant 0.000000e+00 : f32
    %15 = vector.broadcast %cst_14 : f32 to vector<8x256xf32>
    %16 = arith.maximumf %14, %15 : vector<8x256xf32>
    %c0_15 = arith.constant 0 : index
    %c0_16 = arith.constant 0 : index
    %17 = vector.load %arg6[%c0_15, %c0_16] : memref<8x1xf32, #tpu.memory_space<vmem>>, vector<8x1xf32>
    %18 = vector.broadcast %17 : vector<8x1xf32> to vector<8x256xf32>
    %19 = arith.mulf %16, %18 : vector<8x256xf32>
    %cst_17 = arith.constant dense<0.000000e+00> : vector<256xf32>
    %20 = vector.multi_reduction <add>, %19, %cst_17 [0] : vector<8x256xf32> to vector<256xf32>
    %21 = vector.shape_cast %20 : vector<256xf32> to vector<1x256xf32>
    %c0_18 = arith.constant 0 : index
    %c0_19 = arith.constant 0 : index
    %22 = memref.load %arg9[%c0_18, %c0_19] : memref<1x1xf32, #tpu.memory_space<smem>>
    %23 = vector.broadcast %22 : f32 to vector<1x256xf32>
    %24 = arith.addf %21, %23 : vector<1x256xf32>
    %25 = arith.negf %24 : vector<1x256xf32>
    %26 = math.exp %25 : vector<1x256xf32>
    %cst_20 = arith.constant 1.000000e+00 : f32
    %27 = vector.broadcast %cst_20 : f32 to vector<1x256xf32>
    %28 = arith.addf %27, %26 : vector<1x256xf32>
    %29 = arith.divf %27, %28 : vector<1x256xf32>
    %30 = vector.broadcast %29 : vector<1x256xf32> to vector<8x256xf32>
    %31 = arith.mulf %8, %30 : vector<8x256xf32>
    %c0_21 = arith.constant 0 : index
    %c0_22 = arith.constant 0 : index
    %c0_23 = arith.constant 0 : index
    %32 = vector.load %arg10[%c0_21, %c0_22, %c0_23] : memref<1x8x256xf32, #tpu.memory_space<vmem>>, vector<1x8x256xf32>
    %33 = vector.shape_cast %32 : vector<1x8x256xf32> to vector<8x256xf32>
    %34 = vector.shape_cast %31 : vector<8x256xf32> to vector<1x8x256xf32>
    tpu.vector_store %arg10[%c0_21, %c0_22, %c0_23], %34 {strides = array<i32>} : memref<1x8x256xf32, #tpu.memory_space<vmem>>, vector<1x8x256xf32>,
    return
  }
  func.func @transform_0(%arg0: i32, %arg1: i32) -> (i32, i32, i32) {
    %c0_i32 = arith.constant 0 : i32
    %c0_i32_0 = arith.constant 0 : i32
    return %arg0, %c0_i32, %arg1 : i32, i32, i32
  }
  func.func @transform_1(%arg0: i32, %arg1: i32) -> (i32, i32, i32) {
    %c0_i32 = arith.constant 0 : i32
    %c0_i32_0 = arith.constant 0 : i32
    return %arg0, %c0_i32, %arg1 : i32, i32, i32
  }
  func.func @transform_2(%arg0: i32, %arg1: i32) -> (i32, i32) {
    %c0_i32 = arith.constant 0 : i32
    %c0_i32_0 = arith.constant 0 : i32
    %c0_i32_1 = arith.constant 0 : i32
    return %c0_i32, %c0_i32_0 : i32, i32
  }
  func.func @transform_3(%arg0: i32, %arg1: i32) -> (i32, i32) {
    %c0_i32 = arith.constant 0 : i32
    %c0_i32_0 = arith.constant 0 : i32
    %c0_i32_1 = arith.constant 0 : i32
    return %c0_i32, %c0_i32_0 : i32, i32
  }
  func.func @transform_4(%arg0: i32, %arg1: i32) -> (i32, i32) {
    %c0_i32 = arith.constant 0 : i32
    %c0_i32_0 = arith.constant 0 : i32
    %c0_i32_1 = arith.constant 0 : i32
    return %c0_i32, %c0_i32_0 : i32, i32
  }
  func.func @transform_5(%arg0: i32, %arg1: i32) -> (i32, i32) {
    %c0_i32 = arith.constant 0 : i32
    %c0_i32_0 = arith.constant 0 : i32
    %c0_i32_1 = arith.constant 0 : i32
    return %c0_i32, %c0_i32_0 : i32, i32
  }
  func.func @transform_6(%arg0: i32, %arg1: i32) -> (i32, i32) {
    %c0_i32 = arith.constant 0 : i32
    %c0_i32_0 = arith.constant 0 : i32
    %c0_i32_1 = arith.constant 0 : i32
    return %c0_i32, %c0_i32_0 : i32, i32
  }
  func.func @transform_7(%arg0: i32, %arg1: i32) -> (i32, i32) {
    %c0_i32 = arith.constant 0 : i32
    %c0_i32_0 = arith.constant 0 : i32
    %c0_i32_1 = arith.constant 0 : i32
    return %c0_i32, %c0_i32_0 : i32, i32
  }
  func.func @transform_8(%arg0: i32, %arg1: i32) -> (i32, i32, i32) {
    %c0_i32 = arith.constant 0 : i32
    %c0_i32_0 = arith.constant 0 : i32
    return %arg0, %c0_i32, %arg1 : i32, i32, i32
  }
}

</mosaic_0001>

<bundles_post_ra>
// kernel: tpu_custom_call.1
= control target key start
LH: loop header
LB: loop body
LE: loop exit
PB: predicated region body
PF: predicated region fallthrough
CT: control target
= control target key end

     0   :  { %s1721_s0 = inlined_call_operand.hbm [shape: f32[2,4,256], index: 0, kind: input, shape index: {}]   ;;  %s1722_s1 = inlined_call_operand.hbm [shape: f32[2,4,256], index: 1, kind: input, shape index: {}]   ;;  %s1723_s2 = inlined_call_operand.hbm [shape: f32[8,4], index: 2, kind: input, shape index: {}]   ;;  %s1724_s3 = inlined_call_operand.hbm [shape: f32[8,4], index: 3, kind: input, shape index: {}]   ;;  %s1725_s4 = inlined_call_operand.hbm [shape: f32[8,1], index: 4, kind: input, shape index: {}]   ;;  %s1726_s5 = inlined_call_operand.hbm [shape: f32[8,1], index: 5, kind: input, shape index: {}]   ;;  %s1727_s6 = inlined_call_operand.hbm [shape: f32[8,1], index: 6, kind: input, shape index: {}]   ;;  %s1728_s7 = inlined_call_operand.<no memory space> [shape: f32[1,1], index: 7, kind: input, shape index: {}]   ;;  %s1729_s8 = inlined_call_operand.hbm [shape: f32[2,8,256], index: 8, kind: output, shape index: {}]  }
   0x1   :  { %1735 = sst [smem:[#allocation23_spill]] %s1723_s2 }
   0x2   :  { %1736 = sst [smem:[#allocation24_spill]] %s1724_s3 }
   0x3   :  { %1737 = sst [smem:[#allocation25_spill]] %s1725_s4 }
   0x4   :  { %1738 = sst [smem:[#allocation26_spill]] %s1726_s5 }
   0x5   :  { %1739 = sst [smem:[#allocation27_spill]] %s1727_s6 }
   0x6   :  { %13 = sst [smem:[#allocation2]] %s1728_s7 }
   0x7   :  { %14 = vsyncpa [#allocation4], 0 }
   0x8   :  { %16 = vsyncpa [#allocation4 + $0x1], 0 }
   0x9   :  { %17 = vsyncpa [#allocation7], 0 }
   0xa   :  { %19 = vsyncpa [#allocation7 + $0x1], 0 }
   0xb   :  { %20 = vsyncpa [#allocation10], 0 }
   0xc   :  { %21 = vsyncpa [#allocation13], 0 }
   0xd   :  { %22 = vsyncpa [#allocation5], 0 }
   0xe   :  { %24 = vsyncpa [#allocation5 + $0x1], 0  ;;  %s1374_s29 = smov 0   ;;  %s1376_s30 = smov 0  }
   0xf   :  { %s1378_s9 = smov 0   ;;  %s1380_s10 = smov 0  }
  0x10   :  { %s1382_s11 = smov 0   ;;  %s1384_s12 = smov 0  }
  0x11 LB: > { %s1405_s7 = sadd.s32 4294967295, %s1314_s12   ;;  %p846_p0 = scmp.ge.s32.totalorder %s1314_s12, 1  ;;  %s1314_s12 = sphi %s1384_s12, %s30_s12   ;;  %s1310_s11 = sphi %s1382_s11, %s1771_s11   ;;  %s1306_s10 = sphi %s1380_s10, %s1770_s10   ;;  %s1302_s9 = sphi %s1378_s9, %s1769_s9   ;;  %s1298_s30 = sphi %s1376_s30, %s1768_s30   ;;  %s1294_s29 = sphi %s1374_s29, %s1767_s29  }
  0x12   : > { %p1730_p1 = scmp.eq.s32.totalorder %s1405_s7, 0  ;;  %p257_p2 = scmp.lt.s32.totalorder %s1314_s12, 3 }
  0x13   : > { %s1316_s14 = smov [#allocation8]   ;;  %s1317_s16 = smov [#allocation9]  }
  0x14   : > { %p1410_p3 = pnand %p846_p0, %p257_p2  ;;  %s270_s15 = sshll.u32 %s1316_s14, 4  ;;  %s271_s15 = int_to_ptr.vmem [resolvable:$true] %s270_s15 }
  0x15   : > { %s281_s17 = sshll.u32 %s1317_s16, 4  ;;  %s1318_s19 = smov [#allocation12]   ;;  %s1423_s17 = int_to_ptr.vmem [resolvable:$true] %s281_s17 }
  0x16   : > { %s1740_s13 = scalar_select %p1410_p3, 1, 0 }
  0x17   : > { %p910_p5 = pneg %p1410_p3  ;;  %s303_s20 = sshll.u32 %s1318_s19, 4  ;;  %s1425_s20 = int_to_ptr.vmem [resolvable:$true] %s303_s20 }
  0x18   : > { %s1742_s2 = sld [smem:[#allocation23_spill]] }
  0x19   : > { %p1419_p6 = pnand %p910_p5, %p1730_p1 }
  0x1b   : > { %p1435_p8 = pneg %p1419_p6 }
  0x1e   : > { %s1016_s23 = scalar_lea.hbm %s1742_s2, 128 }
  0x1f   : > { %p1017_p7 = scmp.ne.s32.totalorder %s1742_s2, %s1016_s23  ;;  %p1023_p11 = scmp.lt.u32.totalorder %s1016_s23, %s1742_s2 }
  0x21   : > { %p1019_p9 = pnand %p1435_p8, %p1017_p7 }
  0x23   : > { %p1020_p10 = pneg %p1019_p9 }
  0x25   : > { %p1025_p12 = pnand %p1023_p11, %p1020_p10 }
  0x27   : > { %1028 = shalt.err (!%p1025_p12)
}
  0x28   : > { %s1029_s14 = scalar_lea.vmem %s271_s15, 128  ;;  %p1037_p5 = scmp.lt.s32.totalorder %s271_s15, %s271_s15 }
  0x29   : > { %p1030_p13 = scmp.ne.s32.totalorder %s271_s15, %s1029_s14  ;;  %p1038_p4 = scmp.lt.s32.totalorder %s1029_s14, %s1029_s14 }
  0x2b   : > { %p1032_p0 = pnand %p1030_p13, %p1435_p8  ;;  %p1039_p1 = por %p1038_p4, %p1037_p5 }
  0x2d   : > { %p1033_p2 = pneg %p1032_p0 }
  0x2f   : > { %p1040_p3 = pnand %p1039_p1, %p1033_p2 }
  0x31   : > { %1043 = shalt.err (!%p1040_p3)
}
  0x32   : > { %913 = dma.hbm_to_vmem [thread:$0]  (!%p1419_p6), %s1742_s2, 128, %s271_s15, [#allocation7]  }
  0x33   : > { %s1744_s3 = sld [smem:[#allocation24_spill]] }
  0x39   : > { %s1044_s23 = scalar_lea.hbm %s1744_s3, 128 }
  0x3a   : > { %p1045_p7 = scmp.ne.s32.totalorder %s1744_s3, %s1044_s23  ;;  %p1051_p1 = scmp.lt.u32.totalorder %s1044_s23, %s1744_s3 }
  0x3c   : > { %p1047_p9 = pnand %p1045_p7, %p1435_p8 }
  0x3e   : > { %p1048_p4 = pneg %p1047_p9 }
  0x40   : > { %p1053_p3 = pnand %p1051_p1, %p1048_p4 }
  0x42   : > { %1056 = shalt.err (!%p1053_p3)
}
  0x43   : > { %s1057_s15 = scalar_lea.vmem %s1423_s17, 128  ;;  %p1065_p13 = scmp.lt.s32.totalorder %s1423_s17, %s1423_s17 }
  0x44   : > { %p1058_p10 = scmp.ne.s32.totalorder %s1423_s17, %s1057_s15  ;;  %p1066_p0 = scmp.lt.s32.totalorder %s1057_s15, %s1057_s15 }
  0x46   : > { %p1060_p11 = pnand %p1058_p10, %p1435_p8  ;;  %p1067_p2 = por %p1066_p0, %p1065_p13 }
  0x48   : > { %p1061_p12 = pneg %p1060_p11 }
  0x4a   : > { %p1068_p5 = pnand %p1067_p2, %p1061_p12 }
  0x4c   : > { %1071 = shalt.err (!%p1068_p5)
}
  0x4d   : > { %916 = dma.hbm_to_vmem [thread:$0]  (!%p1419_p6), %s1744_s3, 128, %s1423_s17, [#allocation10]  }
  0x4e   : > { %s1745_s5 = sld [smem:[#allocation26_spill]] }
  0x54   : > { %s1072_s22 = scalar_lea.hbm %s1745_s5, 128 }
  0x55   : > { %p1073_p7 = scmp.ne.s32.totalorder %s1745_s5, %s1072_s22  ;;  %p1079_p1 = scmp.lt.u32.totalorder %s1072_s22, %s1745_s5 }
  0x57   : > { %p1075_p9 = pnand %p1073_p7, %p1435_p8 }
  0x59   : > { %p1076_p4 = pneg %p1075_p9 }
  0x5b   : > { %p1081_p3 = pnand %p1079_p1, %p1076_p4 }
  0x5d   : > { %1084 = shalt.err (!%p1081_p3)
}
  0x5e   : > { %s1085_s17 = scalar_lea.vmem %s1425_s20, 128  ;;  %p1093_p13 = scmp.lt.s32.totalorder %s1425_s20, %s1425_s20 }
  0x5f   : > { %p1086_p10 = scmp.ne.s32.totalorder %s1425_s20, %s1085_s17  ;;  %p1094_p0 = scmp.lt.s32.totalorder %s1085_s17, %s1085_s17 }
  0x61   : > { %p1088_p11 = pnand %p1086_p10, %p1435_p8  ;;  %p1095_p2 = por %p1094_p0, %p1093_p13 }
  0x63   : > { %p1089_p12 = pneg %p1088_p11 }
  0x65   : > { %p1096_p5 = pnand %p1095_p2, %p1089_p12 }
  0x67   : > { %1099 = shalt.err (!%p1096_p5)
}
  0x68   : > { %922 = dma.hbm_to_vmem [thread:$0]  (!%p1419_p6), %s1745_s5, 128, %s1425_s20, [#allocation13]  }
  0x69   : > { %s1319_s14 = smov [#allocation11]   ;;  %s1320_s19 = smov [#allocation14]  }
  0x6a   : > { %s292_s16 = sshll.u32 %s1319_s14, 4  ;;  %s314_s21 = sshll.u32 %s1320_s19, 4  ;;  %s293_s16 = int_to_ptr.vmem [resolvable:$true] %s292_s16  ;;  %s315_s21 = int_to_ptr.vmem [resolvable:$true] %s314_s21 }
  0x6b   : > { %s1746_s4 = sld [smem:[#allocation25_spill]] }
  0x71   : > { %s1100_s24 = scalar_lea.hbm %s1746_s4, 128 }
  0x72   : > { %p1101_p7 = scmp.ne.s32.totalorder %s1746_s4, %s1100_s24  ;;  %p1107_p1 = scmp.lt.u32.totalorder %s1100_s24, %s1746_s4 }
  0x74   : > { %p1103_p9 = pnand %p1101_p7, %p1435_p8 }
  0x76   : > { %p1104_p4 = pneg %p1103_p9 }
  0x78   : > { %p1109_p3 = pnand %p1107_p1, %p1104_p4 }
  0x7a   : > { %1112 = shalt.err (!%p1109_p3)
}
  0x7b   : > { %s1113_s20 = scalar_lea.vmem %s293_s16, 128  ;;  %p1121_p13 = scmp.lt.s32.totalorder %s293_s16, %s293_s16 }
  0x7c   : > { %p1114_p10 = scmp.ne.s32.totalorder %s293_s16, %s1113_s20  ;;  %p1122_p0 = scmp.lt.s32.totalorder %s1113_s20, %s1113_s20 }
  0x7e   : > { %p1116_p11 = pnand %p1114_p10, %p1435_p8  ;;  %p1123_p2 = por %p1122_p0, %p1121_p13 }
  0x80   : > { %p1117_p12 = pneg %p1116_p11 }
  0x82   : > { %p1124_p5 = pnand %p1123_p2, %p1117_p12 }
  0x84   : > { %1127 = shalt.err (!%p1124_p5)
}
  0x85   : > { %919 = dma.hbm_to_vmem [thread:$0]  (!%p1419_p6), %s1746_s4, 128, %s293_s16, [#allocation10]  }
  0x86   : > { %s1747_s6 = sld [smem:[#allocation27_spill]] }
  0x8c   : > { %s1128_s23 = scalar_lea.hbm %s1747_s6, 128 }
  0x8d   : > { %p1129_p7 = scmp.ne.s32.totalorder %s1747_s6, %s1128_s23  ;;  %p1135_p1 = scmp.lt.u32.totalorder %s1128_s23, %s1747_s6 }
  0x8f   : > { %p1131_p9 = pnand %p1129_p7, %p1435_p8 }
  0x91   : > { %p1132_p4 = pneg %p1131_p9 }
  0x93   : > { %p1137_p3 = pnand %p1135_p1, %p1132_p4 }
  0x95   : > { %1140 = shalt.err (!%p1137_p3)
}
  0x96   : > { %s1141_s28 = scalar_lea.vmem %s315_s21, 128  ;;  %p1149_p13 = scmp.lt.s32.totalorder %s315_s21, %s315_s21 }
  0x97   : > { %p1142_p10 = scmp.ne.s32.totalorder %s315_s21, %s1141_s28  ;;  %p1150_p0 = scmp.lt.s32.totalorder %s1141_s28, %s1141_s28 }
  0x99   : > { %p1144_p11 = pnand %p1142_p10, %p1435_p8  ;;  %p1151_p2 = por %p1150_p0, %p1149_p13 }
  0x9b   : > { %p1145_p12 = pneg %p1144_p11 }
  0x9d   : > { %p1152_p5 = pnand %p1151_p2, %p1145_p12 }
  0x9f   : > { %1155 = shalt.err (!%p1152_p5)
}
  0xa0   : > { %925 = dma.hbm_to_vmem [thread:$0]  (!%p1419_p6), %s1747_s6, 128, %s315_s21, [#allocation13]  }
  0xa1   : > { %s845_s26 = sadd.s32 4294967294, %s1314_s12   ;;  %s42_s15 = sadd.s32 1, %s1310_s11 }
  0xa2   : > { %s51_s18 = sadd.s32 1, %s1302_s9  ;;  %p44_p8 = scmp.ge.s32.totalorder %s42_s15, 2 }
  0xa3   : > { %p58_p7 = scmp.ne.s32.totalorder %s1302_s9, %s1298_s30  ;;  %p59_p9 = scmp.eq.s32.totalorder %s1314_s12, 0 }
  0xa4   : > { %p64_p4 = scmp.ne.s32.totalorder %s1298_s30, %s1294_s29  ;;  %s1773_s15 = smov (%p44_p8, %s42_s15), 0 }
  0xa5   : > { %1748 = sst [smem:[#allocation22_spill]] %s1773_s15  ;;  %p1543_p1 = por %p59_p9, %p58_p7 }
  0xa6   : > { %p1750_p3 = scmp.eq.s32.totalorder %s1405_s7, 0  ;;  %s46_s19 = ssub.s32 %s1310_s11, %s1773_s15 }
  0xa7   : > { %p244_p10 = scmp.eq.s32.totalorder %s1405_s7, 1  ;;  %p49_p11 = scmp.eq.s32.totalorder %s46_s19, 0 }
  0xa8   : > { %p1549_p6 = por %p1750_p3, %p64_p4  ;;  %p250_p12 = scmp.eq.s32.totalorder %s845_s26, 1 }
  0xa9   : > { %p1556_p13 = por %p244_p10, %p58_p7  ;;  %p942_p0 = scmp.lt.s32.totalorder %s1314_s12, 2 }
  0xaa   : > { %s1751_s21 = scalar_select %p1549_p6, 1, 0 }
  0xab   : > { %s1752_s22 = scalar_select %p1556_p13, 1, 0 }
  0xac   : > { %s1562_s23 = scalar_select %p49_p11, %s1302_s9, %s51_s18  }
  0xad   : > { %p1564_p2 = por %p250_p12, %p64_p4  ;;  %s328_s25 = sand.u32 1, %s1302_s9  }
  0xae   : > { %s1569_s27 = sshll.u32 %s328_s25, 3  ;;  %s881_s17 = sshll.u32 %s1310_s11, 7 }
  0xaf   : > { %s1753_s24 = scalar_select %p1564_p2, 1, 0 }
  0xb0   : > { %s1575_s20 = scalar_lea.hbm %s1721_s0, %s881_s17  ;;  %s332_s26 = scalar_lea.vmem [#allocation3], %s1569_s27 }
  0xb1   : > { %s342_s18 = sshll.u32 %s332_s26, 4  ;;  %p1582_p5 = pnand %p942_p0, %p1543_p1  ;;  %s1578_s18 = int_to_ptr.vmem [resolvable:$true] %s342_s18 }
  0xb2   : > { %s1589_s28 = scalar_lea.hbm %s1722_s1, %s881_s17  ;;  %s349_s16 = sand.u32 1, %s1314_s12  }
  0xb3   : > { %s329_s4 = scalar_lea.sflag [#allocation4], %s328_s25  ;;  %s1156_s5 = scalar_lea.hbm %s1575_s20, 128 }
  0xb4   : > { %p1157_p8 = scmp.ne.s32.totalorder %s1575_s20, %s1156_s5  ;;  %p1158_p7 = pneg %p1582_p5 }
  0xb5   : > { %s1161_s6 = scalar_lea.hbm %s1721_s0, 256  ;;  %p1162_p1 = scmp.lt.u32.totalorder %s1575_s20, %s1721_s0 }
  0xb6   : > { %p1159_p9 = pnand %p1158_p7, %p1157_p8  ;;  %p1163_p3 = scmp.lt.u32.totalorder %s1161_s6, %s1156_s5 }
  0xb7   : > { %p1165_p11 = scmp.lt.u32.totalorder %s1156_s5, %s1575_s20 }
  0xb8   : > { %p1160_p4 = pneg %p1159_p9  ;;  %p1164_p10 = por %p1163_p3, %p1162_p1 }
  0xba   : > { %p1166_p12 = por %p1165_p11, %p1164_p10 }
  0xbc   : > { %p1167_p0 = pnand %p1166_p12, %p1160_p4 }
  0xbe   : > { %1170 = shalt.err (!%p1167_p0)
}
  0xbf   : > { %s1171_s3 = scalar_lea.vmem %s1578_s18, 128  ;;  %s1321_s25 = smov [#allocation3]  }
  0xc0   : > { %p1172_p8 = scmp.ne.s32.totalorder %s1578_s18, %s1171_s3  ;;  %s1176_s17 = sshll.u32 %s1321_s25, 4  ;;  %s1177_s17 = int_to_ptr.vmem [resolvable:$false] %s1176_s17 }
  0xc1   : > { %s1178_s15 = scalar_lea.vmem %s1177_s17, 256  ;;  %p1179_p13 = scmp.lt.s32.totalorder %s1578_s18, %s1177_s17 }
  0xc2   : > { %p1174_p9 = pnand %p1172_p8, %p1158_p7  ;;  %p1180_p1 = scmp.lt.s32.totalorder %s1178_s15, %s1171_s3 }
  0xc4   : > { %p1175_p2 = pneg %p1174_p9  ;;  %p1181_p3 = por %p1180_p1, %p1179_p13 }
  0xc6   : > { %p1182_p10 = pnand %p1181_p3, %p1175_p2 }
  0xc8   : > { %1185 = shalt.err (!%p1182_p10)
}
  0xc9   : > { %929 = dma.hbm_to_vmem [thread:$0]  (!%p1582_p5), %s1575_s20, 128, %s1578_s18, %s329_s4  }
  0xca   : > { %s353_s5 = scalar_lea.vmem [#allocation6], %s1569_s27  ;;  %s350_s14 = scalar_lea.sflag [#allocation7], %s349_s16 }
  0xcb   : > { %s363_s6 = sshll.u32 %s353_s5, 4  ;;  %s1186_s26 = scalar_lea.hbm %s1589_s28, 128  ;;  %s364_s6 = int_to_ptr.vmem [resolvable:$true] %s363_s6 }
  0xcc   : > { %p1187_p13 = scmp.ne.s32.totalorder %s1589_s28, %s1186_s26  ;;  %s1191_s25 = scalar_lea.hbm %s1722_s1, 256 }
  0xcd   : > { %p1192_p11 = scmp.lt.u32.totalorder %s1589_s28, %s1722_s1  ;;  %p1193_p12 = scmp.lt.u32.totalorder %s1191_s25, %s1186_s26 }
  0xce   : > { %p1189_p2 = pnand %p1187_p13, %p1158_p7  ;;  %p1195_p8 = scmp.lt.u32.totalorder %s1186_s26, %s1589_s28 }
  0xcf   : > { %p1194_p0 = por %p1193_p12, %p1192_p11 }
  0xd0   : > { %p1190_p4 = pneg %p1189_p2 }
  0xd1   : > { %p1196_p9 = por %p1195_p8, %p1194_p0 }
  0xd3   : > { %p1197_p1 = pnand %p1196_p9, %p1190_p4 }
  0xd5   : > { %1200 = shalt.err (!%p1197_p1)
}
  0xd6   : > { %s1201_s4 = scalar_lea.vmem %s364_s6, 128  ;;  %s1322_s27 = smov [#allocation6]  }
  0xd7   : > { %p1202_p3 = scmp.ne.s32.totalorder %s364_s6, %s1201_s4  ;;  %s1206_s20 = sshll.u32 %s1322_s27, 4  ;;  %s1207_s20 = int_to_ptr.vmem [resolvable:$false] %s1206_s20 }
  0xd8   : > { %s1208_s18 = scalar_lea.vmem %s1207_s20, 256  ;;  %p1209_p2 = scmp.lt.s32.totalorder %s364_s6, %s1207_s20 }
  0xd9   : > { %p1204_p10 = pnand %p1202_p3, %p1158_p7  ;;  %p1210_p6 = scmp.lt.s32.totalorder %s1208_s18, %s1201_s4 }
  0xdb   : > { %p1205_p13 = pneg %p1204_p10  ;;  %p1211_p11 = por %p1210_p6, %p1209_p2 }
  0xdd   : > { %p1212_p12 = pnand %p1211_p11, %p1205_p13 }
  0xdf   : > { %1215 = shalt.err (!%p1212_p12)
}
  0xe0   : > { %932 = dma.hbm_to_vmem [thread:$0]  (!%p1582_p5), %s1589_s28, 128, %s364_s6, %s350_s14  }
  0xe1   : > { %p1755_p4 = scmp.ne.s32.totalorder %s1740_s13, 0 }
  0xe2   : > { %s1642_s16 = sand.u32 (!%p1755_p4), 1, %s1298_s30   ;;  %p1756_p7 = scmp.ne.s32.totalorder (!%p1755_p4), %s1751_s21, 0 }
  0xe3   : > { %372 = sbr.rel (%p1755_p4) target bundleno = 531 (0x213), region = 52  ;;  %s860_s5 = sshll.u32 (!%p1755_p4), %s1642_s16, 3 }
  0xe4   : > { %s375_s26 = scalar_lea.sflag (!%p1755_p4), [#allocation4], %s1642_s16  ;;  %s378_s2 = scalar_lea.vmem (!%p1755_p4), [#allocation3], %s860_s5 }
  0xea   : > { %1269 = dma.done.wait (%p1756_p7), %s375_s26, 128  }
  0xeb   : > { %1271 = vsyncadd (%p1756_p7), %s375_s26, 4294967168  ;;  %s383_s19 = sand.u32 1, %s1405_s7   ;;  %s387_s13 = scalar_lea.vmem [#allocation6], %s860_s5 }
  0xec   : > { %s384_s28 = scalar_lea.sflag [#allocation7], %s383_s19 }
  0xed   : > { %1273 = dma.done.wait (%p1756_p7), %s384_s28, 128  }
  0xee   : > { %1275 = vsyncadd (%p1756_p7), %s384_s28, 4294967168  ;;  %p1757_p6 = scmp.eq.s32.totalorder %s1405_s7, 0 }
  0xf0   : > { %1277 = dma.done.wait (%p1757_p6), [#allocation7], 128   ;;  %p1758_p5 = pmov %p1757_p6 }
  0xf2   : > { %1279 = vsyncadd (%p1758_p5), [#allocation7], 4294967168  ;;  %p1759_p0 = pmov %p1758_p5 }
  0xf4   : > { %1281 = dma.done.wait (%p1759_p0), [#allocation10], 256   ;;  %p1760_p8 = pmov %p1759_p0 }
  0xf5   : > { %p1761_p9 = pmov %p1759_p0 }
  0xf6   : > { %1283 = vsyncadd (%p1760_p8), [#allocation10], 4294967040 }
  0xf7   : > { %1285 = dma.done.wait (%p1761_p9), [#allocation13], 256   ;;  %p1762_p1 = pmov %p1759_p0 }
  0xf8   : > { %v1323_v0 = vmov 0.0   ;;  %v1324_v1 = vmov 0   ;;  %v449_v2 = vld [vmem:[%s387_s13] sm:$0xff]  ;;  %vm463_vm0 = vcmask 1043456   ;;  %v448_v3 = vld [vmem:[%s378_s2] sm:$0xff]  ;;  %vm459_vm1 = vcmask 31744  }
  0xf9   : > { %1287 = vsyncadd (%p1762_p1), [#allocation13], 4294967040  ;;  %532 = vmatprep.mubr.f32.mxu0 %v1323_v0  ;;  %619 = vmatprep.mubr.f32.mxu1 %v1323_v0  ;;  %v458_v4 = vcombine.high %v449_v2, %v449_v2  ;;  %v547_v5 = vcombine.high %v448_v3, %v448_v3  ;;  %v451_v6 = vld [vmem:[#allocation14] sm:$0xff]  ;;  %v450_v7 = vld [vmem:[#allocation9] sm:$0xff]  ;;  %s650_s7 = sld [smem:[#allocation2]]  ;;  %s867_s21 = sshll.u32 %s1642_s16, 4 }
  0xfa   : > { %1004 = vset.pattern.permute.xlu0 %v1324_v1  ;;  %1005 = vset.pattern.permute.xlu1 %v1324_v1  ;;  %v539_v8 = vld [vmem:[#allocation8] sm:$0xff]  ;;  %v540_v9 = vld [vmem:[#allocation12] sm:$0xff]  ;;  %v630_v10 = vld [vmem:[#allocation11] sm:$0xff]  ;;  %s883_s6 = sshll.u32 %s1306_s10, 8  ;;  %s444_s14 = scalar_lea.vmem [#allocation15], %s867_s21 }
  0xfb   : > { %454 = vperm.xlu0 %1004, %v451_v6   ;;  %868 = vmatprep.subr.msk.mxu0 %vm463_vm0, %v458_v4  ;;  %s687_s3 = sshll.u32 %s444_s14, 4  ;;  %s1672_s15 = scalar_lea.hbm %s1729_s8, %s883_s6  ;;  %s1674_s3 = int_to_ptr.vmem [resolvable:$true] %s687_s3 }
  0xfc   : > { %871 = vmatprep.subr.msk.mxu1 %vm463_vm0, %v547_v5  ;;  %869 = vmatpush1.msk.msra.mxu0 %vm463_vm0, %v449_v2  ;;  %s671_s4 = scalar_lea.sflag [#allocation5], %s1642_s16  ;;  %s1216_s10 = scalar_lea.vmem %s1674_s3, 256 }
  0xfd   : > { %872 = vmatpush1.msk.msra.mxu1 %vm463_vm0, %v448_v3  ;;  %870 = vmatmul.mubr.msk.f32.vlgmr.msra.gmra.mrb[0].mxu0 %vm459_vm1, %v450_v7  ;;  %p1217_p3 = scmp.ne.s32.totalorder %s1674_s3, %s1216_s10  ;;  %p1763_p10 = scmp.ne.s32.totalorder %s1752_s22, 0 }
  0xfe   : > { %873 = vmatmul.mubr.msk.f32.vlgmr.msra.gmra.mrb[0].mxu1 %vm459_vm1, %v539_v8  ;;  %633 = vperm.xlu1 %1005, %v630_v10   ;;  %s1325_s27 = smov [#allocation15]  }
  0xff   : > { %543 = vperm.xlu0 %1004, %v540_v9   ;;  %v651_v37 = vstv %s650_s7  ;;  %p1218_p13 = pnand %p1217_p3, %p1763_p10  ;;  %s1220_s20 = sshll.u32 %s1325_s27, 4  ;;  %s1221_s20 = int_to_ptr.vmem [resolvable:$false] %s1220_s20 }
 0x100   : > { %s1222_s18 = scalar_lea.vmem %s1221_s20, 512  ;;  %p1223_p11 = scmp.lt.s32.totalorder %s1674_s3, %s1221_s20 }
 0x101   : > { %p1219_p2 = pneg %p1218_p13  ;;  %p1224_p12 = scmp.lt.s32.totalorder %s1222_s18, %s1216_s10 }
 0x103   : > { %p1225_p4 = por %p1224_p12, %p1223_p11 }
 0x105   : > { %p1226_p7 = pnand %p1225_p4, %p1219_p2 }
 0x17a   : > { %v455_v11 = vpop.permute.xlu0 %454 }
 0x17d   : > { %v634_v23 = vpop.permute.xlu1 %633 }
 0x17e   : > { %v544_v12 = vpop.permute.xlu0 %543 }
 0x1d0   : > { %v534_v13 = vpop.f32.mrb[0].mxu0 }
 0x1d1   : > { %v621_v14 = vpop.f32.mrb[0].mxu1  ;;  %v535_v15 = vadd.f32 %v534_v13, %v455_v11  ;;  %v536_v17 = vpop.f32.mrb[1].mxu0 }
 0x1d2   : > { %v622_v16 = vadd.f32 %v621_v14, %v544_v12  ;;  %v623_v18 = vpop.f32.mrb[1].mxu1  ;;  %v537_v19 = vadd.f32 %v536_v17, %v455_v11 }
 0x1d3   : > { %v624_v20 = vadd.f32 %v623_v18, %v544_v12 }
 0x1d4   : > { %v626_v21 = vadd.f32 %v622_v16, %v535_v15 }
 0x1d5   : > { %v627_v22 = vadd.f32 %v624_v20, %v537_v19 }
 0x1d6   : > { %v628_v24 = vmax.f32 %v626_v21, 0.0 }
 0x1d7   : > { %v629_v25 = vmax.f32 %v627_v22, 0.0 }
 0x1d8   : > { %v636_v26 = vmul.f32 %v634_v23, %v628_v24 }
 0x1d9   : > { %v637_v27 = vmul.f32 %v634_v23, %v629_v25 }
 0x1da   : > { %v638_v28 = vrot.slane %v636_v26, 4 }
 0x1db   : > { %v644_v29 = vrot.slane %v637_v27, 4 }
 0x1dc   : > { %v639_v30 = vadd.f32 %v638_v28, %v636_v26 }
 0x1dd   : > { %v645_v31 = vadd.f32 %v644_v29, %v637_v27 }
 0x1de   : > { %v640_v32 = vrot.slane %v639_v30, 2 }
 0x1df   : > { %v646_v33 = vrot.slane %v645_v31, 2 }
 0x1e0   : > { %v641_v34 = vadd.f32 %v640_v32, %v639_v30 }
 0x1e1   : > { %v647_v35 = vadd.f32 %v646_v33, %v645_v31 }
 0x1e2   : > { %v642_v36 = vrot.slane %v641_v34, 1 }
 0x1e3   : > { %v648_v38 = vrot.slane %v647_v35, 1 }
 0x1e4   : > { %v643_v39 = vadd.f32 %v642_v36, %v641_v34 }
 0x1e5   : > { %v649_v40 = vadd.f32 %v648_v38, %v647_v35 }
 0x1e6   : > { %v652_v41 = vadd.f32 %v651_v37, %v643_v39 }
 0x1e7   : > { %v653_v42 = vadd.f32 %v651_v37, %v649_v40 }
 0x1e8   : > { %v874_v43 = vmul.f32 -1.442695, %v652_v41 }
 0x1e9   : > { %v875_v44 = vmul.f32 -1.442695, %v653_v42 }
 0x1ea   : > { %1008 = vpow2.f32 %v874_v43 }
 0x1eb   : > { %1010 = vpow2.f32 %v875_v44 }
 0x1f4   : > { %v1009_v45 = vpop.eup %1008 }
 0x1f5   : > { %v1011_v46 = vpop.eup %1010  ;;  %v660_v47 = vadd.f32 1.0, %v1009_v45 }
 0x1f6   : > { %v661_v48 = vadd.f32 1.0, %v1011_v46 }
 0x1f7   : > { %1012 = vrcp.f32 %v660_v47 }
 0x1f8   : > { %1014 = vrcp.f32 %v661_v48 }
 0x201   : > { %v1013_v49 = vpop.eup %1012 }
 0x202   : > { %v1015_v50 = vpop.eup %1014  ;;  %v666_v51 = vmul.f32 %v1013_v49, %v535_v15 }
 0x203   : > { %v667_v52 = vmul.f32 %v1015_v50, %v537_v19 }
 0x204   : > { %668 = vst [vmem:[%s444_s14] sm:$0xff] %v666_v51 }
 0x205   : > { %669 = vst [vmem:[%s444_s14 + $0x8] sm:$0xff] %v667_v52 }
 0x206   : > { %1229 = shalt.err (!%p1226_p7)
}
 0x207   : > { %s1230_s16 = scalar_lea.hbm %s1672_s15, 256  ;;  %s1234_s2 = scalar_lea.hbm %s1729_s8, 512 }
 0x208   : > { %p1231_p6 = scmp.ne.s32.totalorder %s1672_s15, %s1230_s16  ;;  %p1235_p8 = scmp.lt.u32.totalorder %s1672_s15, %s1729_s8 }
 0x209   : > { %p1236_p9 = scmp.lt.u32.totalorder %s1234_s2, %s1230_s16  ;;  %p1238_p3 = scmp.lt.u32.totalorder %s1230_s16, %s1672_s15 }
 0x20a   : > { %p1232_p5 = pnand %p1231_p6, %p1763_p10 }
 0x20b   : > { %p1237_p1 = por %p1236_p9, %p1235_p8 }
 0x20c   : > { %p1233_p0 = pneg %p1232_p5 }
 0x20d   : > { %p1239_p13 = por %p1238_p3, %p1237_p1 }
 0x20f   : > { %p1240_p2 = pnand %p1239_p13, %p1233_p0 }
 0x211   : > { %1243 = shalt.err (!%p1240_p2)
}
 0x212   : > { %908 = dma.vmem_to_hbm [thread:$0]  (%p1763_p10), %s1674_s3, 256, %s1672_s15, %s671_s4  }
 0x213 PF: > { %s699_s13 = sand.u32 1, %s1294_s29   ;;  %p1764_p11 = scmp.ne.s32.totalorder %s1753_s24, 0 }
 0x214   : > { %p1765_p12 = scmp.ge.s32.totalorder %s1314_s12, 2  ;;  %s700_s7 = scalar_lea.sflag [#allocation5], %s699_s13 }
 0x216   : > { %p934_p4 = pnand %p1765_p12, %p1764_p11 }
 0x218   : > { %1289 = dma.done.wait (!%p934_p4), %s700_s7, 256  }
 0x219   : > { %1291 = vsyncadd (!%p934_p4), %s700_s7, 4294967040  ;;  %s30_s12 = sadd.s32 1, %s1314_s12   ;;  %s1766_s22 = sld [smem:[#allocation22_spill]] }
 0x21a   : > { %p27_p7 = scmp.ge.s32.totalorder %s30_s12, 4   ;;  %s1767_s29 = smov %s1298_s30 }
 0x21b   : > { %s1768_s30 = smov %s1302_s9  ;;  %s1769_s9 = smov %s1562_s23 }
 0x21c   : > { %s1770_s10 = smov %s1310_s11  ;;  %29 = sbr.rel (!%p27_p7) target bundleno = 17 (0x11), region = 130 }
 0x21f   : > { %s1771_s11 = smov %s1766_s22 }
 0x223   :  { %705 = vsyncpa [#allocation4], 1 }
 0x224   :  { %707 = vsyncpa [#allocation4 + $0x1], 1 }
 0x225   :  { %708 = vsyncpa [#allocation7], 1 }
 0x226   :  { %710 = vsyncpa [#allocation7 + $0x1], 1 }
 0x227   :  { %711 = vsyncpa [#allocation10], 1 }
 0x228   :  { %712 = vsyncpa [#allocation13], 1 }
 0x229   :  { %713 = vsyncpa [#allocation5], 1 }
 0x22a   :  { %715 = vsyncpa [#allocation5 + $0x1], 1 }

</bundles_post_ra>
